<compile_context>
chip_gen: v7x
topology: tpu7x:2x2x1
jax: 0.10.0
libtpu: 0.0.40
codegen_flags: <defaults>
</compile_context>

<pallas_src>
import jax
import jax.numpy as jnp
from jax.experimental import pallas as pl
from jax.experimental.pallas import tpu as pltpu


def _round_up(x, m):
    return ((x + m - 1) // m) * m


# ----------------------------------------------------------------------------
# Kernel
# ----------------------------------------------------------------------------
def _sigmoid(z):
    # sigmoid(z) = 1 / (1 + exp(-z)).  exp and the approximate reciprocal both
    # run on the EUP (its own VLIW slot); the VALU only sees the add/negate.
    return pl.reciprocal(1.0 + jnp.exp(-z), approx=True)


def _dense_vpu(h, w, b):
    """w @ h + b without the MXU.

    h: (K, TB) lane-dense activations (features on sublanes, batch on lanes)
    w: (M, K) torch-layout weight, b: (M, 1) bias
    Unrolled over K (K <= 8): each term is one full-width (M, TB) VPU mul/add.
    """
    acc = w[:, 0:1] * h[0:1, :] + b          # (M,1)*(1,TB) -> (M,TB), + bias
    for k in range(1, w.shape[1]):           # K <= 8, unrolled at trace time
        acc = acc + w[:, k:k+1] * h[k:k+1, :]
    return acc


def _mlp_kernel(x_ref, wp_ref, o_ref):
    # x_ref: (TB, 8) contiguous slab of the torch-layout (B, 8) input.
    # Single in-kernel transpose to lane-dense (8, TB): batch on the 128-wide
    # lane axis, features on sublanes.  Everything downstream is full-width.
    x = x_ref[...].T                                            # (8, TB)

    wp = wp_ref[...]                                            # (8, 128) packed params
    w0, b0 = wp[:,    0:8],   wp[:,    22:23]                   # (8,8), (8,1)
    w1, b1 = wp[0:4,  8:16],  wp[0:4,  23:24]                   # (4,8), (4,1)
    w2, b2 = wp[0:2, 16:20],  wp[0:2,  24:25]                   # (2,4), (2,1)
    w3, b3 = wp[0:2, 20:22],  wp[0:2,  25:26]                   # (2,2), (2,1)

    h = _sigmoid(_dense_vpu(x, w0, b0))                         # (8, TB)
    h = _sigmoid(_dense_vpu(h, w1, b1))                         # (4, TB)
    h = _sigmoid(_dense_vpu(h, w2, b2))                         # (2, TB)
    h = _dense_vpu(h, w3, b3)                                   # (2, TB), no activation

    o_ref[...] = h.astype(o_ref.dtype)                          # lane-dense store


# ----------------------------------------------------------------------------
# Wrappers
# ----------------------------------------------------------------------------
def _pack_params(params):
    """Pack all weights/biases (torch layout: W (out,in), b (out,)) into a
    single (8, 128) f32 block — one 4 KiB VMEM-resident input."""
    wp = jnp.zeros((8, 128), jnp.float32)
    wp = wp.at[:,    0:8  ].set(params["w0"])
    wp = wp.at[0:4,  8:16 ].set(params["w1"])
    wp = wp.at[0:2, 16:20 ].set(params["w2"])
    wp = wp.at[0:2, 20:22 ].set(params["w3"])
    wp = wp.at[:,   22:23 ].set(params["b0"].reshape(8, 1))
    wp = wp.at[0:4, 23:24 ].set(params["b1"].reshape(4, 1))
    wp = wp.at[0:2, 24:25 ].set(params["b2"].reshape(2, 1))
    wp = wp.at[0:2, 25:26 ].set(params["b3"].reshape(2, 1))
    return wp


def mlp_forward_fm(x, params, *, tb=8192):
    """Fast path: torch-layout (B, 8) input -> feature-major (2, B) output.

    Zero wrapper-side HBM passes (no x.T, no jnp.pad, no output transpose);
    ragged batch tails are handled by a partial last grid block.
    """
    B = x.shape[0]
    wp = _pack_params(params)

    if B <= 256:
        # One block covering the full arrays (block dims == array dims is
        # always legal, for any B).  No padding, no partial blocks.
        tb_eff, grid = B, (1,)
    else:
        b_ceil = _round_up(B, 128)
        tb_eff = max(128, min(_round_up(tb, 128), b_ceil))
        # Keep >= 2 grid steps so "parallel" can shard across v7x's 2 TCs.
        tb_eff = max(128, min(tb_eff, _round_up((b_ceil + 1) // 2, 128)))
        grid = (pl.cdiv(B, tb_eff),)

    return pl.pallas_call(
        _mlp_kernel,
        out_shape=jax.ShapeDtypeStruct((2, B), jnp.float32),
        grid=grid,
        in_specs=[
            # Contiguous (TB, 8) slab of the (B, 8) input; last block may be
            # partial (OOB rows are garbage lanes that never contaminate valid
            # lanes — everything downstream is per-lane — and the matching OOB
            # output lanes are dropped on writeback).
            pl.BlockSpec((tb_eff, 8), lambda i: (i, 0)),
            # Packed params: fetched once, stays VMEM-resident.
            pl.BlockSpec((8, 128), lambda i: (0, 0)),
        ],
        # Lane-dense output tile: full-width stores, no vst.msk.
        out_specs=pl.BlockSpec((2, tb_eff), lambda i: (0, i)),
        compiler_params=pltpu.CompilerParams(
            dimension_semantics=("parallel",),
            # TB=8192 worst case: ~8 MiB double-buffered (lane-padded) input
            # block + <1 MiB rest — safe on v5e/v6e (128 MiB) and v7x (64 MiB).
            vmem_limit_bytes=32 * 1024 * 1024,
        ),
    )(x, wp)


def mlp_forward(x, params, *, tb=8192):
    """Torch-convention wrapper: (B, 8) -> (B, 2).

    The only remaining wrapper pass is the transpose of the SMALL output
    (8 B/elem of the 40 B/elem total); callers that can consume feature-major
    output should use `mlp_forward_fm` and skip it entirely.
    """
    return mlp_forward_fm(x, params, tb=tb).T


# ----------------------------------------------------------------------------
# Reference & demo
# ----------------------------------------------------------------------------
def init_params(key):
    """Deterministic synthetic parameters in exact nn.Linear layout:
    W (out_features, in_features), b (out_features,)."""
    dims = [(8, 8), (4, 8), (2, 4), (2, 2)]
    params = {}
    for i, (fan_out, fan_in) in enumerate(dims):
        key, kw, kb = jax.random.split(key, 3)
        bound = 1.0 / float(fan_in) ** 0.5
        params[f"w{i}"] = jax.random.uniform(kw, (fan_out, fan_in), jnp.float32, -bound, bound)
        params[f"b{i}"] = jax.random.uniform(kb, (fan_out,), jnp.float32, -bound, bound)
    return params


def mlp_reference(x, params):
    """Pure-JAX reference with torch semantics: y = x @ W.T + b."""
    h = jax.nn.sigmoid(x @ params["w0"].T + params["b0"])
    h = jax.nn.sigmoid(h @ params["w1"].T + params["b1"])
    h = jax.nn.sigmoid(h @ params["w2"].T + params["b2"])
    return h @ params["w3"].T + params["b3"]


if __name__ == "__main__":
    root = jax.random.PRNGKey(0)
    kparam, kx0, kx1, kx2 = jax.random.split(root, 4)
    params = init_params(kparam)

    # (B, tb) cases: tiny single-block, 2-step ragged, 4-step ragged.
    checks = [(8, 8192), (384, 8192), (1000, 256)]
    keys = (kx0, kx1, kx2)

    # Tolerance is loose-ish because the sigmoid uses the EUP approximate
    # reciprocal (a few ULPs); real layout/weight bugs would be O(0.1-1).
    ATOL = RTOL = 1e-2

    for (B, tb), kx in zip(checks, keys):
        x = jax.random.normal(kx, (B, 8), dtype=jnp.float32)
        ref = mlp_reference(x, params)

        out = jax.block_until_ready(mlp_forward(x, params, tb=tb))
        assert out.shape == (B, 2)
        assert jnp.allclose(out, ref, atol=ATOL, rtol=RTOL), f"torch-conv mismatch at B={B}"

        out_fm = jax.block_until_ready(mlp_forward_fm(x, params, tb=tb))
        assert out_fm.shape == (2, B)
        assert jnp.allclose(out_fm.T, ref, atol=ATOL, rtol=RTOL), f"fm mismatch at B={B}"

    print("KERNEL_OK")
</pallas_src>

<mosaic_0001>
module attributes {stable_mosaic.version = 11 : i64} {
  func.func @_mlp_kernel(%arg0: i32, %arg1: memref<8x8xf32, #tpu.memory_space<vmem>>, %arg2: memref<8x128xf32, #tpu.memory_space<vmem>>, %arg3: memref<2x8xf32, #tpu.memory_space<vmem>>) attributes {dimension_semantics = [#tpu.dimension_semantics<parallel>], iteration_bounds = array<i64: 1>, scalar_prefetch = 0 : i64, scratch_operands = 0 : i64, tpu.core_type = #tpu.core_type<tc>, window_params = [{transform_indices = @transform_0, window_bounds = array<i64: 8, 8>}, {pipeline_mode = #tpu.pipeline_mode<synchronous>, transform_indices = @transform_1, window_bounds = array<i64: 8, 128>}, {transform_indices = @transform_2, window_bounds = array<i64: 2, 8>}]} {
    %c0 = arith.constant 0 : index
    %c0_0 = arith.constant 0 : index
    %0 = vector.load %arg1[%c0, %c0_0] : memref<8x8xf32, #tpu.memory_space<vmem>>, vector<8x8xf32>
    %1 = tpu.transpose %0, [1, 0] : vector<8x8xf32> -> vector<8x8xf32>
    %c0_1 = arith.constant 0 : index
    %c0_2 = arith.constant 0 : index
    %2 = vector.load %arg2[%c0_1, %c0_2] : memref<8x128xf32, #tpu.memory_space<vmem>>, vector<8x128xf32>
    %3 = vector.extract_strided_slice %2 {offsets = [0, 0], sizes = [8, 8], strides = [1, 1]} : vector<8x128xf32> to vector<8x8xf32>
    %4 = vector.extract_strided_slice %2 {offsets = [0, 22], sizes = [8, 1], strides = [1, 1]} : vector<8x128xf32> to vector<8x1xf32>
    %5 = vector.extract_strided_slice %2 {offsets = [0, 8], sizes = [4, 8], strides = [1, 1]} : vector<8x128xf32> to vector<4x8xf32>
    %6 = vector.extract_strided_slice %2 {offsets = [0, 23], sizes = [4, 1], strides = [1, 1]} : vector<8x128xf32> to vector<4x1xf32>
    %7 = vector.extract_strided_slice %2 {offsets = [0, 16], sizes = [2, 4], strides = [1, 1]} : vector<8x128xf32> to vector<2x4xf32>
    %8 = vector.extract_strided_slice %2 {offsets = [0, 24], sizes = [2, 1], strides = [1, 1]} : vector<8x128xf32> to vector<2x1xf32>
    %9 = vector.extract_strided_slice %2 {offsets = [0, 20], sizes = [2, 2], strides = [1, 1]} : vector<8x128xf32> to vector<2x2xf32>
    %10 = vector.extract_strided_slice %2 {offsets = [0, 25], sizes = [2, 1], strides = [1, 1]} : vector<8x128xf32> to vector<2x1xf32>
    %11 = vector.extract_strided_slice %3 {offsets = [0, 0], sizes = [8, 1], strides = [1, 1]} : vector<8x8xf32> to vector<8x1xf32>
    %12 = vector.extract_strided_slice %1 {offsets = [0, 0], sizes = [1, 8], strides = [1, 1]} : vector<8x8xf32> to vector<1x8xf32>
    %13 = vector.broadcast %11 : vector<8x1xf32> to vector<8x8xf32>
    %14 = vector.broadcast %12 : vector<1x8xf32> to vector<8x8xf32>
    %15 = arith.mulf %13, %14 : vector<8x8xf32>
    %16 = vector.broadcast %4 : vector<8x1xf32> to vector<8x8xf32>
    %17 = arith.addf %15, %16 : vector<8x8xf32>
    %18 = vector.extract_strided_slice %3 {offsets = [0, 1], sizes = [8, 1], strides = [1, 1]} : vector<8x8xf32> to vector<8x1xf32>
    %19 = vector.extract_strided_slice %1 {offsets = [1, 0], sizes = [1, 8], strides = [1, 1]} : vector<8x8xf32> to vector<1x8xf32>
    %20 = vector.broadcast %18 : vector<8x1xf32> to vector<8x8xf32>
    %21 = vector.broadcast %19 : vector<1x8xf32> to vector<8x8xf32>
    %22 = arith.mulf %20, %21 : vector<8x8xf32>
    %23 = arith.addf %17, %22 : vector<8x8xf32>
    %24 = vector.extract_strided_slice %3 {offsets = [0, 2], sizes = [8, 1], strides = [1, 1]} : vector<8x8xf32> to vector<8x1xf32>
    %25 = vector.extract_strided_slice %1 {offsets = [2, 0], sizes = [1, 8], strides = [1, 1]} : vector<8x8xf32> to vector<1x8xf32>
    %26 = vector.broadcast %24 : vector<8x1xf32> to vector<8x8xf32>
    %27 = vector.broadcast %25 : vector<1x8xf32> to vector<8x8xf32>
    %28 = arith.mulf %26, %27 : vector<8x8xf32>
    %29 = arith.addf %23, %28 : vector<8x8xf32>
    %30 = vector.extract_strided_slice %3 {offsets = [0, 3], sizes = [8, 1], strides = [1, 1]} : vector<8x8xf32> to vector<8x1xf32>
    %31 = vector.extract_strided_slice %1 {offsets = [3, 0], sizes = [1, 8], strides = [1, 1]} : vector<8x8xf32> to vector<1x8xf32>
    %32 = vector.broadcast %30 : vector<8x1xf32> to vector<8x8xf32>
    %33 = vector.broadcast %31 : vector<1x8xf32> to vector<8x8xf32>
    %34 = arith.mulf %32, %33 : vector<8x8xf32>
    %35 = arith.addf %29, %34 : vector<8x8xf32>
    %36 = vector.extract_strided_slice %3 {offsets = [0, 4], sizes = [8, 1], strides = [1, 1]} : vector<8x8xf32> to vector<8x1xf32>
    %37 = vector.extract_strided_slice %1 {offsets = [4, 0], sizes = [1, 8], strides = [1, 1]} : vector<8x8xf32> to vector<1x8xf32>
    %38 = vector.broadcast %36 : vector<8x1xf32> to vector<8x8xf32>
    %39 = vector.broadcast %37 : vector<1x8xf32> to vector<8x8xf32>
    %40 = arith.mulf %38, %39 : vector<8x8xf32>
    %41 = arith.addf %35, %40 : vector<8x8xf32>
    %42 = vector.extract_strided_slice %3 {offsets = [0, 5], sizes = [8, 1], strides = [1, 1]} : vector<8x8xf32> to vector<8x1xf32>
    %43 = vector.extract_strided_slice %1 {offsets = [5, 0], sizes = [1, 8], strides = [1, 1]} : vector<8x8xf32> to vector<1x8xf32>
    %44 = vector.broadcast %42 : vector<8x1xf32> to vector<8x8xf32>
    %45 = vector.broadcast %43 : vector<1x8xf32> to vector<8x8xf32>
    %46 = arith.mulf %44, %45 : vector<8x8xf32>
    %47 = arith.addf %41, %46 : vector<8x8xf32>
    %48 = vector.extract_strided_slice %3 {offsets = [0, 6], sizes = [8, 1], strides = [1, 1]} : vector<8x8xf32> to vector<8x1xf32>
    %49 = vector.extract_strided_slice %1 {offsets = [6, 0], sizes = [1, 8], strides = [1, 1]} : vector<8x8xf32> to vector<1x8xf32>
    %50 = vector.broadcast %48 : vector<8x1xf32> to vector<8x8xf32>
    %51 = vector.broadcast %49 : vector<1x8xf32> to vector<8x8xf32>
    %52 = arith.mulf %50, %51 : vector<8x8xf32>
    %53 = arith.addf %47, %52 : vector<8x8xf32>
    %54 = vector.extract_strided_slice %3 {offsets = [0, 7], sizes = [8, 1], strides = [1, 1]} : vector<8x8xf32> to vector<8x1xf32>
    %55 = vector.extract_strided_slice %1 {offsets = [7, 0], sizes = [1, 8], strides = [1, 1]} : vector<8x8xf32> to vector<1x8xf32>
    %56 = vector.broadcast %54 : vector<8x1xf32> to vector<8x8xf32>
    %57 = vector.broadcast %55 : vector<1x8xf32> to vector<8x8xf32>
    %58 = arith.mulf %56, %57 : vector<8x8xf32>
    %59 = arith.addf %53, %58 : vector<8x8xf32>
    %cst = arith.constant 0.000000e+00 : f32
    %60 = vector.broadcast %cst : f32 to vector<8x8xf32>
    %61 = arith.subf %60, %59 : vector<8x8xf32>
    %62 = math.exp %61 : vector<8x8xf32>
    %cst_3 = arith.constant 1.000000e+00 : f32
    %63 = vector.broadcast %cst_3 : f32 to vector<8x8xf32>
    %64 = arith.addf %63, %62 : vector<8x8xf32>
    %65 = tpu.reciprocal %64 {approx = true} : vector<8x8xf32> -> vector<8x8xf32>
    %66 = vector.extract_strided_slice %5 {offsets = [0, 0], sizes = [4, 1], strides = [1, 1]} : vector<4x8xf32> to vector<4x1xf32>
    %67 = vector.extract_strided_slice %65 {offsets = [0, 0], sizes = [1, 8], strides = [1, 1]} : vector<8x8xf32> to vector<1x8xf32>
    %68 = vector.broadcast %66 : vector<4x1xf32> to vector<4x8xf32>
    %69 = vector.broadcast %67 : vector<1x8xf32> to vector<4x8xf32>
    %70 = arith.mulf %68, %69 : vector<4x8xf32>
    %71 = vector.broadcast %6 : vector<4x1xf32> to vector<4x8xf32>
    %72 = arith.addf %70, %71 : vector<4x8xf32>
    %73 = vector.extract_strided_slice %5 {offsets = [0, 1], sizes = [4, 1], strides = [1, 1]} : vector<4x8xf32> to vector<4x1xf32>
    %74 = vector.extract_strided_slice %65 {offsets = [1, 0], sizes = [1, 8], strides = [1, 1]} : vector<8x8xf32> to vector<1x8xf32>
    %75 = vector.broadcast %73 : vector<4x1xf32> to vector<4x8xf32>
    %76 = vector.broadcast %74 : vector<1x8xf32> to vector<4x8xf32>
    %77 = arith.mulf %75, %76 : vector<4x8xf32>
    %78 = arith.addf %72, %77 : vector<4x8xf32>
    %79 = vector.extract_strided_slice %5 {offsets = [0, 2], sizes = [4, 1], strides = [1, 1]} : vector<4x8xf32> to vector<4x1xf32>
    %80 = vector.extract_strided_slice %65 {offsets = [2, 0], sizes = [1, 8], strides = [1, 1]} : vector<8x8xf32> to vector<1x8xf32>
    %81 = vector.broadcast %79 : vector<4x1xf32> to vector<4x8xf32>
    %82 = vector.broadcast %80 : vector<1x8xf32> to vector<4x8xf32>
    %83 = arith.mulf %81, %82 : vector<4x8xf32>
    %84 = arith.addf %78, %83 : vector<4x8xf32>
    %85 = vector.extract_strided_slice %5 {offsets = [0, 3], sizes = [4, 1], strides = [1, 1]} : vector<4x8xf32> to vector<4x1xf32>
    %86 = vector.extract_strided_slice %65 {offsets = [3, 0], sizes = [1, 8], strides = [1, 1]} : vector<8x8xf32> to vector<1x8xf32>
    %87 = vector.broadcast %85 : vector<4x1xf32> to vector<4x8xf32>
    %88 = vector.broadcast %86 : vector<1x8xf32> to vector<4x8xf32>
    %89 = arith.mulf %87, %88 : vector<4x8xf32>
    %90 = arith.addf %84, %89 : vector<4x8xf32>
    %91 = vector.extract_strided_slice %5 {offsets = [0, 4], sizes = [4, 1], strides = [1, 1]} : vector<4x8xf32> to vector<4x1xf32>
    %92 = vector.extract_strided_slice %65 {offsets = [4, 0], sizes = [1, 8], strides = [1, 1]} : vector<8x8xf32> to vector<1x8xf32>
    %93 = vector.broadcast %91 : vector<4x1xf32> to vector<4x8xf32>
    %94 = vector.broadcast %92 : vector<1x8xf32> to vector<4x8xf32>
    %95 = arith.mulf %93, %94 : vector<4x8xf32>
    %96 = arith.addf %90, %95 : vector<4x8xf32>
    %97 = vector.extract_strided_slice %5 {offsets = [0, 5], sizes = [4, 1], strides = [1, 1]} : vector<4x8xf32> to vector<4x1xf32>
    %98 = vector.extract_strided_slice %65 {offsets = [5, 0], sizes = [1, 8], strides = [1, 1]} : vector<8x8xf32> to vector<1x8xf32>
    %99 = vector.broadcast %97 : vector<4x1xf32> to vector<4x8xf32>
    %100 = vector.broadcast %98 : vector<1x8xf32> to vector<4x8xf32>
    %101 = arith.mulf %99, %100 : vector<4x8xf32>
    %102 = arith.addf %96, %101 : vector<4x8xf32>
    %103 = vector.extract_strided_slice %5 {offsets = [0, 6], sizes = [4, 1], strides = [1, 1]} : vector<4x8xf32> to vector<4x1xf32>
    %104 = vector.extract_strided_slice %65 {offsets = [6, 0], sizes = [1, 8], strides = [1, 1]} : vector<8x8xf32> to vector<1x8xf32>
    %105 = vector.broadcast %103 : vector<4x1xf32> to vector<4x8xf32>
    %106 = vector.broadcast %104 : vector<1x8xf32> to vector<4x8xf32>
    %107 = arith.mulf %105, %106 : vector<4x8xf32>
    %108 = arith.addf %102, %107 : vector<4x8xf32>
    %109 = vector.extract_strided_slice %5 {offsets = [0, 7], sizes = [4, 1], strides = [1, 1]} : vector<4x8xf32> to vector<4x1xf32>
    %110 = vector.extract_strided_slice %65 {offsets = [7, 0], sizes = [1, 8], strides = [1, 1]} : vector<8x8xf32> to vector<1x8xf32>
    %111 = vector.broadcast %109 : vector<4x1xf32> to vector<4x8xf32>
    %112 = vector.broadcast %110 : vector<1x8xf32> to vector<4x8xf32>
    %113 = arith.mulf %111, %112 : vector<4x8xf32>
    %114 = arith.addf %108, %113 : vector<4x8xf32>
    %cst_4 = arith.constant 0.000000e+00 : f32
    %115 = vector.broadcast %cst_4 : f32 to vector<4x8xf32>
    %116 = arith.subf %115, %114 : vector<4x8xf32>
    %117 = math.exp %116 : vector<4x8xf32>
    %cst_5 = arith.constant 1.000000e+00 : f32
    %118 = vector.broadcast %cst_5 : f32 to vector<4x8xf32>
    %119 = arith.addf %118, %117 : vector<4x8xf32>
    %120 = tpu.reciprocal %119 {approx = true} : vector<4x8xf32> -> vector<4x8xf32>
    %121 = vector.extract_strided_slice %7 {offsets = [0, 0], sizes = [2, 1], strides = [1, 1]} : vector<2x4xf32> to vector<2x1xf32>
    %122 = vector.extract_strided_slice %120 {offsets = [0, 0], sizes = [1, 8], strides = [1, 1]} : vector<4x8xf32> to vector<1x8xf32>
    %123 = vector.broadcast %121 : vector<2x1xf32> to vector<2x8xf32>
    %124 = vector.broadcast %122 : vector<1x8xf32> to vector<2x8xf32>
    %125 = arith.mulf %123, %124 : vector<2x8xf32>
    %126 = vector.broadcast %8 : vector<2x1xf32> to vector<2x8xf32>
    %127 = arith.addf %125, %126 : vector<2x8xf32>
    %128 = vector.extract_strided_slice %7 {offsets = [0, 1], sizes = [2, 1], strides = [1, 1]} : vector<2x4xf32> to vector<2x1xf32>
    %129 = vector.extract_strided_slice %120 {offsets = [1, 0], sizes = [1, 8], strides = [1, 1]} : vector<4x8xf32> to vector<1x8xf32>
    %130 = vector.broadcast %128 : vector<2x1xf32> to vector<2x8xf32>
    %131 = vector.broadcast %129 : vector<1x8xf32> to vector<2x8xf32>
    %132 = arith.mulf %130, %131 : vector<2x8xf32>
    %133 = arith.addf %127, %132 : vector<2x8xf32>
    %134 = vector.extract_strided_slice %7 {offsets = [0, 2], sizes = [2, 1], strides = [1, 1]} : vector<2x4xf32> to vector<2x1xf32>
    %135 = vector.extract_strided_slice %120 {offsets = [2, 0], sizes = [1, 8], strides = [1, 1]} : vector<4x8xf32> to vector<1x8xf32>
    %136 = vector.broadcast %134 : vector<2x1xf32> to vector<2x8xf32>
    %137 = vector.broadcast %135 : vector<1x8xf32> to vector<2x8xf32>
    %138 = arith.mulf %136, %137 : vector<2x8xf32>
    %139 = arith.addf %133, %138 : vector<2x8xf32>
    %140 = vector.extract_strided_slice %7 {offsets = [0, 3], sizes = [2, 1], strides = [1, 1]} : vector<2x4xf32> to vector<2x1xf32>
    %141 = vector.extract_strided_slice %120 {offsets = [3, 0], sizes = [1, 8], strides = [1, 1]} : vector<4x8xf32> to vector<1x8xf32>
    %142 = vector.broadcast %140 : vector<2x1xf32> to vector<2x8xf32>
    %143 = vector.broadcast %141 : vector<1x8xf32> to vector<2x8xf32>
    %144 = arith.mulf %142, %143 : vector<2x8xf32>
    %145 = arith.addf %139, %144 : vector<2x8xf32>
    %cst_6 = arith.constant 0.000000e+00 : f32
    %146 = vector.broadcast %cst_6 : f32 to vector<2x8xf32>
    %147 = arith.subf %146, %145 : vector<2x8xf32>
    %148 = math.exp %147 : vector<2x8xf32>
    %cst_7 = arith.constant 1.000000e+00 : f32
    %149 = vector.broadcast %cst_7 : f32 to vector<2x8xf32>
    %150 = arith.addf %149, %148 : vector<2x8xf32>
    %151 = tpu.reciprocal %150 {approx = true} : vector<2x8xf32> -> vector<2x8xf32>
    %152 = vector.extract_strided_slice %9 {offsets = [0, 0], sizes = [2, 1], strides = [1, 1]} : vector<2x2xf32> to vector<2x1xf32>
    %153 = vector.extract_strided_slice %151 {offsets = [0, 0], sizes = [1, 8], strides = [1, 1]} : vector<2x8xf32> to vector<1x8xf32>
    %154 = vector.broadcast %152 : vector<2x1xf32> to vector<2x8xf32>
    %155 = vector.broadcast %153 : vector<1x8xf32> to vector<2x8xf32>
    %156 = arith.mulf %154, %155 : vector<2x8xf32>
    %157 = vector.broadcast %10 : vector<2x1xf32> to vector<2x8xf32>
    %158 = arith.addf %156, %157 : vector<2x8xf32>
    %159 = vector.extract_strided_slice %9 {offsets = [0, 1], sizes = [2, 1], strides = [1, 1]} : vector<2x2xf32> to vector<2x1xf32>
    %160 = vector.extract_strided_slice %151 {offsets = [1, 0], sizes = [1, 8], strides = [1, 1]} : vector<2x8xf32> to vector<1x8xf32>
    %161 = vector.broadcast %159 : vector<2x1xf32> to vector<2x8xf32>
    %162 = vector.broadcast %160 : vector<1x8xf32> to vector<2x8xf32>
    %163 = arith.mulf %161, %162 : vector<2x8xf32>
    %164 = arith.addf %158, %163 : vector<2x8xf32>
    %c0_8 = arith.constant 0 : index
    %c0_9 = arith.constant 0 : index
    %165 = vector.load %arg3[%c0_8, %c0_9] : memref<2x8xf32, #tpu.memory_space<vmem>>, vector<2x8xf32>
    tpu.vector_store %arg3[%c0_8, %c0_9], %164 {strides = array<i32>} : memref<2x8xf32, #tpu.memory_space<vmem>>, vector<2x8xf32>,
    return
  }
  func.func @transform_0(%arg0: i32) -> (i32, i32) {
    %c0_i32 = arith.constant 0 : i32
    %c0_i32_0 = arith.constant 0 : i32
    return %arg0, %c0_i32 : i32, i32
  }
  func.func @transform_1(%arg0: i32) -> (i32, i32) {
    %c0_i32 = arith.constant 0 : i32
    %c0_i32_0 = arith.constant 0 : i32
    %c0_i32_1 = arith.constant 0 : i32
    return %c0_i32, %c0_i32_0 : i32, i32
  }
  func.func @transform_2(%arg0: i32) -> (i32, i32) {
    %c0_i32 = arith.constant 0 : i32
    %c0_i32_0 = arith.constant 0 : i32
    return %c0_i32, %arg0 : i32, i32
  }
}

</mosaic_0001>

<bundles_post_ra>
// kernel: tpu_custom_call.1
= control target key start
LH: loop header
LB: loop body
LE: loop exit
PB: predicated region body
PF: predicated region fallthrough
CT: control target
= control target key end

     0   :  { %7 = vsyncpa [#allocation3], 0  ;;  %s620_s0 = inlined_call_operand.hbm [shape: f32[8,8], index: 0, kind: input, shape index: {}]   ;;  %s621_s1 = inlined_call_operand.hbm [shape: f32[8,128], index: 1, kind: input, shape index: {}]   ;;  %s622_s2 = inlined_call_operand.hbm [shape: f32[2,8], index: 2, kind: output, shape index: {}]  }
   0x1   :  { %8 = vsyncpa [#allocation6], 0 }
   0x2   :  { %9 = vsyncpa [#allocation4], 0  ;;  %s480_s9 = smov [#allocation2]   ;;  %s481_s11 = smov [#allocation5]  }
   0x3   :  { %s16_s10 = sshll.u32 %s480_s9, 4  ;;  %s26_s12 = sshll.u32 %s481_s11, 4  ;;  %s17_s10 = int_to_ptr.vmem [resolvable:$true] %s16_s10  ;;  %s27_s12 = int_to_ptr.vmem [resolvable:$true] %s26_s12 }
   0x4   :  { %s408_s15 = scalar_lea.hbm %s620_s0, 128 }
   0x5   :  { %p409_p0 = scmp.ne.s32.totalorder %s620_s0, %s408_s15  ;;  %p412_p1 = scmp.lt.u32.totalorder %s408_s15, %s620_s0 }
   0x7   :  { %p414_p2 = pnand %p412_p1, %p409_p0 }
   0x9   :  { %417 = shalt.err (!%p414_p2)
}
   0xa   :  { %s418_s20 = scalar_lea.vmem %s17_s10, 128  ;;  %p423_p4 = scmp.lt.s32.totalorder %s17_s10, %s17_s10 }
   0xb   :  { %p419_p3 = scmp.ne.s32.totalorder %s17_s10, %s418_s20  ;;  %p424_p5 = scmp.lt.s32.totalorder %s418_s20, %s418_s20 }
   0xd   :  { %p425_p6 = por %p424_p5, %p423_p4 }
   0xf   :  { %p426_p7 = pnand %p425_p6, %p419_p3 }
  0x11   :  { %429 = shalt.err (!%p426_p7)
}
  0x12   :  { %19 = dma.hbm_to_vmem [thread:$0]  %s620_s0, 128, %s17_s10, [#allocation3]  }
  0x13   :  { %s430_s25 = scalar_lea.hbm %s621_s1, 128 }
  0x14   :  { %p431_p8 = scmp.ne.s32.totalorder %s621_s1, %s430_s25  ;;  %p434_p9 = scmp.lt.u32.totalorder %s430_s25, %s621_s1 }
  0x16   :  { %p436_p10 = pnand %p434_p9, %p431_p8 }
  0x18   :  { %439 = shalt.err (!%p436_p10)
}
  0x19   :  { %s440_s30 = scalar_lea.vmem %s27_s12, 128  ;;  %p445_p12 = scmp.lt.s32.totalorder %s27_s12, %s27_s12 }
  0x1a   :  { %p441_p11 = scmp.ne.s32.totalorder %s27_s12, %s440_s30  ;;  %p446_p13 = scmp.lt.s32.totalorder %s440_s30, %s440_s30 }
  0x1c   :  { %p447_p0 = por %p446_p13, %p445_p12 }
  0x1e   :  { %p448_p1 = pnand %p447_p0, %p441_p11 }
  0x20   :  { %451 = shalt.err (!%p448_p1)
}
  0x21   :  { %29 = dma.hbm_to_vmem [thread:$0]  %s621_s1, 128, %s27_s12, [#allocation6]  }
  0x22   :  { %474 = dma.done.wait [#allocation3], 128  }
  0x23   :  { %475 = vsyncadd [#allocation3], 4294967168 }
  0x24   :  { %476 = dma.done.wait [#allocation6], 128  }
  0x25   :  { %477 = vsyncadd [#allocation6], 4294967168  ;;  %v482_v0 = vmov 1   ;;  %v483_v1 = vmov 0   ;;  %v548_v2 = vld [vmem:[#allocation5] sm:$0xff]  ;;  %v484_v3 = vmov 2   ;;  %v75_v31 = vlaneseq }
  0x26   :  { %372 = vset.pattern.permute.xlu1 %v482_v0  ;;  %370 = vset.pattern.permute.xlu0 %v483_v1  ;;  %v485_v4 = vmov 22   ;;  %v486_v5 = vmov 3   ;;  %v487_v6 = vmov 4   ;;  %v488_v7 = vmov 5   ;;  %v36_v18 = vld [vmem:[#allocation2] sm:$0xff]  ;;  %s508_s1 = smov [#allocation7]  }
  0x27   :  { %86 = vperm.xlu1 %372, %v548_v2   ;;  %72 = vperm.xlu0 %370, %v548_v2   ;;  %v489_v8 = vmov 7   ;;  %v490_v9 = vmov 6   ;;  %v491_v10 = vmov 8   ;;  %v492_v11 = vmov 23   ;;  %s330_s4 = sshll.u32 %s508_s1, 4  ;;  %s331_s4 = int_to_ptr.vmem [resolvable:$true] %s330_s4 }
  0x28   :  { %v493_v12 = vmov 9   ;;  %v494_v13 = vmov 10   ;;  %v495_v14 = vmov 11   ;;  %v496_v15 = vmov 13   ;;  %s452_s5 = scalar_lea.vmem %s331_s4, 32  ;;  %p457_p3 = scmp.lt.s32.totalorder %s331_s4, %s331_s4 }
  0x29   :  { %v497_v16 = vmov 14   ;;  %v498_v17 = vmov 15   ;;  %v499_v19 = vmov 24   ;;  %v500_v20 = vmov 19   ;;  %p453_p2 = scmp.ne.s32.totalorder %s331_s4, %s452_s5  ;;  %p458_p4 = scmp.lt.s32.totalorder %s452_s5, %s452_s5 }
  0x2a   :  { %v501_v21 = vmov 21   ;;  %v502_v22 = vmov 12   ;;  %v503_v23 = vmov 16   ;;  %v504_v24 = vmov 17  }
  0x2b   :  { %373 = vset.pattern.permute.xlu1 %v484_v3  ;;  %371 = vset.pattern.permute.xlu0 %v485_v4  ;;  %v505_v25 = vmov 18   ;;  %v506_v26 = vmov 20   ;;  %v507_v27 = vmov 25   ;;  %v576_v33 = vshrl.u32 %v75_v31, 7  ;;  %p459_p5 = por %p458_p4, %p457_p3 }
  0x2c   :  { %96 = vperm.xlu1 %373, %v548_v2   ;;  %81 = vperm.xlu0 %371, %v548_v2   ;;  %vm322_vm0 = vcmask 58368  }
  0x2d   :  { %v579_v36 = vsub.s32 0, %v576_v33  ;;  %v582_v37 = vsub.s32 1, %v576_v33  ;;  %v585_v38 = vsub.s32 2, %v576_v33  ;;  %v588_v40 = vsub.s32 3, %v576_v33  ;;  %p460_p6 = pnand %p459_p5, %p453_p2 }
  0x2e   :  { %v121_v44 = vsub.s32 4, %v576_v33  ;;  %v131_v47 = vsub.s32 5, %v576_v33  ;;  %v141_v51 = vsub.s32 6, %v576_v33  ;;  %v151_v56 = vsub.s32 7, %v576_v33 }
  0x30   :  { %374 = vset.pattern.permute.xlu1 %v486_v5  ;;  %375 = vset.pattern.permute.xlu0 %v487_v6 }
  0x31   :  { %106 = vperm.xlu1 %374, %v548_v2   ;;  %116 = vperm.xlu0 %375, %v548_v2  }
  0x35   :  { %376 = vset.pattern.permute.xlu1 %v488_v7  ;;  %378 = vset.pattern.permute.xlu0 %v489_v8 }
  0x36   :  { %126 = vperm.xlu1 %376, %v548_v2   ;;  %146 = vperm.xlu0 %378, %v548_v2  }
  0x3a   :  { %377 = vset.pattern.permute.xlu1 %v490_v9  ;;  %379 = vset.pattern.permute.xlu0 %v491_v10 }
  0x3b   :  { %136 = vperm.xlu1 %377, %v548_v2   ;;  %161 = vperm.xlu0 %379, %v548_v2  }
  0x3f   :  { %380 = vset.pattern.permute.xlu0 %v492_v11 }
  0x40   :  { %170 = vperm.xlu0 %380, %v548_v2  }
  0x44   :  { %381 = vset.pattern.permute.xlu0 %v493_v12 }
  0x45   :  { %175 = vperm.xlu0 %381, %v548_v2  }
  0x49   :  { %382 = vset.pattern.permute.xlu0 %v494_v13 }
  0x4a   :  { %185 = vperm.xlu0 %382, %v548_v2  }
  0x4e   :  { %383 = vset.pattern.permute.xlu0 %v495_v14 }
  0x4f   :  { %195 = vperm.xlu0 %383, %v548_v2  }
  0x53   :  { %385 = vset.pattern.permute.xlu0 %v496_v15 }
  0x54   :  { %215 = vperm.xlu0 %385, %v548_v2  }
  0x58   :  { %386 = vset.pattern.permute.xlu0 %v497_v16 }
  0x59   :  { %225 = vperm.xlu0 %386, %v548_v2  }
  0x5d   :  { %387 = vset.pattern.permute.xlu0 %v498_v17 }
  0x5e   :  { %235 = vperm.xlu0 %387, %v548_v2  }
  0x62   :  { %389 = vset.pattern.permute.xlu0 %v499_v19 }
  0x63   :  { %259 = vperm.xlu0 %389, %v548_v2  }
  0x64   :  { %37 = vxpose.xlu1.b32.start.end [1/1] (short) (narrow) %v36_v18, 8 }
  0x67   :  { %392 = vset.pattern.permute.xlu0 %v500_v20 }
  0x68   :  { %284 = vperm.xlu0 %392, %v548_v2  }
  0x6c   :  { %395 = vset.pattern.permute.xlu0 %v501_v21 }
  0x6d   :  { %313 = vperm.xlu0 %395, %v548_v2  }
  0x82   :  { %384 = vset.pattern.permute.xlu1 %v502_v22 }
  0x83   :  { %205 = vperm.xlu1 %384, %v548_v2  }
  0x87   :  { %388 = vset.pattern.permute.xlu1 %v503_v23 }
  0x88   :  { %250 = vperm.xlu1 %388, %v548_v2  }
  0x8c   :  { %390 = vset.pattern.permute.xlu1 %v504_v24 }
  0x8d   :  { %264 = vperm.xlu1 %390, %v548_v2  }
  0x91   :  { %391 = vset.pattern.permute.xlu1 %v505_v25 }
  0x92   :  { %274 = vperm.xlu1 %391, %v548_v2  }
  0x96   :  { %393 = vset.pattern.permute.xlu1 %v506_v26 }
  0x97   :  { %299 = vperm.xlu1 %393, %v548_v2  }
  0x9b   :  { %394 = vset.pattern.permute.xlu1 %v507_v27 }
  0x9c   :  { %308 = vperm.xlu1 %394, %v548_v2  }
  0xa6   :  { %v87_v28 = vpop.permute.xlu1 %86  ;;  %v73_v35 = vpop.permute.xlu0 %72 }
  0xab   :  { %v97_v29 = vpop.permute.xlu1 %96  ;;  %v82_v43 = vpop.permute.xlu0 %81 }
  0xb0   :  { %v107_v30 = vpop.permute.xlu1 %106  ;;  %v117_v55 = vpop.permute.xlu0 %116 }
  0xb5   :  { %v127_v32 = vpop.permute.xlu1 %126  ;;  %v147_v2 = vpop.permute.xlu0 %146 }
  0xba   :  { %v137_v34 = vpop.permute.xlu1 %136  ;;  %v162_v8 = vpop.permute.xlu0 %161 }
  0xbf   :  { %v171_v11 = vpop.permute.xlu0 %170 }
  0xc4   :  { %v176_v12 = vpop.permute.xlu0 %175 }
  0xc9   :  { %v186_v15 = vpop.permute.xlu0 %185 }
  0xce   :  { %v196_v16 = vpop.permute.xlu0 %195 }
  0xd3   :  { %v216_v20 = vpop.permute.xlu0 %215 }
  0xe4   :  { %v53_v39 = vpop.trf.xlu1 }
  0xe5   :  { %v78_v41 = vrot.slane %v53_v39, %v579_v36  ;;  %v92_v42 = vrot.slane %v53_v39, %v582_v37  ;;  %v102_v46 = vrot.slane %v53_v39, %v585_v38  ;;  %v112_v50 = vrot.slane %v53_v39, %v588_v40 }
  0xe6   :  { %v122_v54 = vrot.slane %v53_v39, %v121_v44  ;;  %v132_v59 = vrot.slane %v53_v39, %v131_v47  ;;  %v142_v62 = vrot.slane %v53_v39, %v141_v51  ;;  %v152_v1 = vrot.slane %v53_v39, %v151_v56 }
  0xe7   :  { %v79_v45 = vmul.f32 %v78_v41, %v73_v35  ;;  %v93_v49 = vmul.f32 %v92_v42, %v87_v28  ;;  %v103_v53 = vmul.f32 %v102_v46, %v97_v29  ;;  %v113_v58 = vmul.f32 %v112_v50, %v107_v30  ;;  %v226_v29 = vpop.permute.xlu0 %225 }
  0xe8   :  { %v123_v61 = vmul.f32 %v122_v54, %v117_v55  ;;  %v133_v0 = vmul.f32 %v132_v59, %v127_v32  ;;  %v143_v4 = vmul.f32 %v142_v62, %v137_v34  ;;  %v153_v6 = vmul.f32 %v152_v1, %v147_v2 }
  0xe9   :  { %v84_v48 = vadd.f32 %v82_v43, %v79_v45 }
  0xeb   :  { %v94_v52 = vadd.f32 %v93_v49, %v84_v48  ;;  %v236_v45 = vpop.permute.xlu0 %235 }
  0xed   :  { %v104_v57 = vadd.f32 %v103_v53, %v94_v52 }
  0xef   :  { %v114_v60 = vadd.f32 %v113_v58, %v104_v57 }
  0xf1   :  { %v124_v63 = vadd.f32 %v123_v61, %v114_v60 }
  0xf3   :  { %v134_v3 = vadd.f32 %v133_v0, %v124_v63 }
  0xf5   :  { %v144_v5 = vadd.f32 %v143_v4, %v134_v3 }
  0xf7   :  { %v154_v7 = vadd.f32 %v153_v6, %v144_v5 }
  0xf9   :  { %v155_v9 = vsub.f32 0.0, %v154_v7 }
  0xfb   :  { %v156_v10 = vmul.f32 1.442695, %v155_v9 }
  0xfd   :  { %396 = vpow2.f32 %v156_v10 }
 0x102   :  { %v206_v30 = vpop.permute.xlu1 %205 }
 0x107   :  { %v397_v13 = vpop.eup %396  ;;  %v251_v57 = vpop.permute.xlu1 %250 }
 0x108   :  { %v158_v14 = vadd.f32 1.0, %v397_v13 }
 0x10a   :  { %398 = vrcp.f32 %v158_v14 }
 0x114   :  { %v399_v17 = vpop.eup %398 }
 0x115   :  { %v167_v18 = vrot.slane %v399_v17, %v579_v36  ;;  %v181_v19 = vrot.slane %v399_v17, %v582_v37  ;;  %v191_v22 = vrot.slane %v399_v17, %v585_v38  ;;  %v201_v25 = vrot.slane %v399_v17, %v588_v40 }
 0x116   :  { %v211_v28 = vrot.slane %v399_v17, %v121_v44  ;;  %v221_v33 = vrot.slane %v399_v17, %v131_v47  ;;  %v231_v35 = vrot.slane %v399_v17, %v141_v51  ;;  %v241_v42 = vrot.slane %v399_v17, %v151_v56  ;;  %v265_v47 = vpop.permute.xlu1 %264  ;;  %v260_v51 = vpop.permute.xlu0 %259 }
 0x117   :  { %v168_v21 = vmul.f32 %v167_v18, %v162_v8  ;;  %v182_v24 = vmul.f32 %v181_v19, %v176_v12  ;;  %v192_v27 = vmul.f32 %v191_v22, %v186_v15  ;;  %v202_v32 = vmul.f32 %v201_v25, %v196_v16 }
 0x118   :  { %v212_v39 = vmul.f32 %v211_v28, %v206_v30  ;;  %v222_v41 = vmul.f32 %v221_v33, %v216_v20  ;;  %v232_v46 = vmul.f32 %v231_v35, %v226_v29  ;;  %v242_v49 = vmul.f32 %v241_v42, %v236_v45 }
 0x119   :  { %v173_v23 = vadd.f32 %v171_v11, %v168_v21 }
 0x11a   :  { %v275_v62 = vpop.permute.xlu1 %274  ;;  %v285_v2 = vpop.permute.xlu0 %284 }
 0x11b   :  { %v183_v26 = vadd.f32 %v182_v24, %v173_v23 }
 0x11d   :  { %v193_v31 = vadd.f32 %v192_v27, %v183_v26 }
 0x11e   :  { %v300_v12 = vpop.permute.xlu1 %299  ;;  %v314_v15 = vpop.permute.xlu0 %313 }
 0x11f   :  { %v203_v34 = vadd.f32 %v202_v32, %v193_v31 }
 0x121   :  { %v213_v43 = vadd.f32 %v212_v39, %v203_v34 }
 0x123   :  { %v223_v48 = vadd.f32 %v222_v41, %v213_v43 }
 0x125   :  { %v233_v50 = vadd.f32 %v232_v46, %v223_v48 }
 0x127   :  { %v243_v52 = vadd.f32 %v242_v49, %v233_v50 }
 0x129   :  { %v244_v53 = vsub.f32 0.0, %v243_v52 }
 0x12b   :  { %v245_v54 = vmul.f32 1.442695, %v244_v53 }
 0x12d   :  { %400 = vpow2.f32 %v245_v54 }
 0x137   :  { %v401_v44 = vpop.eup %400 }
 0x138   :  { %v247_v55 = vadd.f32 1.0, %v401_v44 }
 0x13a   :  { %402 = vrcp.f32 %v247_v55 }
 0x144   :  { %v403_v58 = vpop.eup %402 }
 0x145   :  { %v256_v59 = vrot.slane %v403_v58, %v579_v36  ;;  %v270_v56 = vrot.slane %v403_v58, %v582_v37  ;;  %v280_v61 = vrot.slane %v403_v58, %v585_v38  ;;  %v290_v1 = vrot.slane %v403_v58, %v588_v40  ;;  %v309_v40 = vpop.permute.xlu1 %308 }
 0x147   :  { %v257_v60 = vmul.f32 %v256_v59, %v251_v57  ;;  %v271_v0 = vmul.f32 %v270_v56, %v265_v47  ;;  %v281_v4 = vmul.f32 %v280_v61, %v275_v62  ;;  %v291_v5 = vmul.f32 %v290_v1, %v285_v2 }
 0x149   :  { %v262_v63 = vadd.f32 %v260_v51, %v257_v60 }
 0x14b   :  { %v272_v3 = vadd.f32 %v271_v0, %v262_v63 }
 0x14d   :  { %v282_v6 = vadd.f32 %v281_v4, %v272_v3 }
 0x14f   :  { %v292_v7 = vadd.f32 %v291_v5, %v282_v6 }
 0x151   :  { %v293_v8 = vsub.f32 0.0, %v292_v7 }
 0x153   :  { %v294_v9 = vmul.f32 1.442695, %v293_v8 }
 0x155   :  { %404 = vpow2.f32 %v294_v9 }
 0x15f   :  { %v405_v10 = vpop.eup %404 }
 0x160   :  { %v296_v11 = vadd.f32 1.0, %v405_v10 }
 0x162   :  { %406 = vrcp.f32 %v296_v11 }
 0x16c   :  { %v407_v13 = vpop.eup %406 }
 0x16d   :  { %v305_v38 = vrot.slane %v407_v13, %v579_v36  ;;  %v319_v14 = vrot.slane %v407_v13, %v582_v37 }
 0x16f   :  { %v306_v16 = vmul.f32 %v305_v38, %v300_v12  ;;  %v320_v17 = vmul.f32 %v319_v14, %v314_v15 }
 0x171   :  { %v311_v18 = vadd.f32 %v309_v40, %v306_v16 }
 0x173   :  { %v321_v19 = vadd.f32 %v320_v17, %v311_v18 }
 0x175   :  { %323 = vst.msk [vmem:[#allocation7] sm:$0x3] %vm322_vm0, %v321_v19 }
 0x176   :  { %463 = shalt.err (!%p460_p6)
}
 0x177   :  { %s464_s8 = scalar_lea.hbm %s622_s2, 32 }
 0x178   :  { %p465_p7 = scmp.ne.s32.totalorder %s622_s2, %s464_s8  ;;  %p468_p8 = scmp.lt.u32.totalorder %s464_s8, %s622_s2 }
 0x17a   :  { %p470_p9 = pnand %p468_p8, %p465_p7 }
 0x17c   :  { %473 = shalt.err (!%p470_p9)
}
 0x17d   :  { %333 = dma.vmem_to_hbm [thread:$0]  %s331_s4, 32, %s622_s2, [#allocation4]  }
 0x17e   :  { %478 = dma.done.wait [#allocation4], 32  }
 0x17f   :  { %479 = vsyncadd [#allocation4], 4294967264 }
 0x180   :  { %337 = vsyncpa [#allocation3], 1 }
 0x181   :  { %338 = vsyncpa [#allocation6], 1 }
 0x182   :  { %339 = vsyncpa [#allocation4], 1 }

</bundles_post_ra>
